<compile_context>
chip_gen: v5e
topology: v5e:2x2
jax: 0.10.0
libtpu: 0.0.40
codegen_flags: <defaults>
</compile_context>

<pallas_src>
import functools

import jax
import jax.numpy as jnp
from jax import lax
from jax.experimental import pallas as pl
from jax.experimental.pallas import tpu as pltpu

SIGMA_DATA = 0.5  # EDMScaling default (the "Karras" scaling used by sgm)


# ----------------------------------------------------------------------------
# Pallas kernel: Karras scalings + synthetic denoiser net + skip/out combine
#
#   sig_ref  : (F_TILE, 1)      per-frame sigma (VMEM)
#   x_ref    : (F_TILE, C*HW)   frames, channel-major within a row (VMEM)
#   w_ref    : (2*C*C,)         stacked 1x1-conv weights, SMEM scalars
#   b_ref    : (2*C,)           biases, SMEM scalars
#   beta_ref : (2*C,)           c_noise gains, SMEM scalars
#   o_ref    : (F_TILE, C*HW)
# Grid axis 0 selects the half: 0 = bad_network, 1 = network.
# ----------------------------------------------------------------------------
def _denoiser_kernel(sig_ref, x_ref, w_ref, b_ref, beta_ref, o_ref, *, hw, c):
    g = pl.program_id(0)                       # 0 = bad half, 1 = good half
    f = sig_ref.shape[0]

    sig = sig_ref[...]                         # (F, 1)
    sd = jnp.float32(SIGMA_DATA)
    sd2 = sd * sd
    denom = sig * sig + sd2
    inv = lax.rsqrt(denom)
    c_skip = sd2 / denom                       # sd^2 / (s^2 + sd^2)
    c_out = sig * sd * inv                     # s*sd / sqrt(s^2 + sd^2)
    cin_cout = sig * sd / denom                # c_in * c_out (folded)
    cn_cout = (0.25 * jnp.log(sig)) * c_out    # c_noise * c_out (folded)

    # hoist lane-broadcasts of the per-frame vectors out of the channel loop
    cin_cout_b = jnp.broadcast_to(cin_cout, (f, hw))
    c_skip_b = jnp.broadcast_to(c_skip, (f, hw))

    # per-channel slabs, each (F, HW), lane-dense.  Offsets are static; with
    # HW % 128 == 0 (typical latents) they are lane-tile aligned.
    xc = [x_ref[:, ci * hw:(ci + 1) * hw] for ci in range(c)]

    wbase = g * (c * c)
    vbase = g * c
    for co in range(c):
        # 4x4 channel mix on the VPU with scalar weights read from SMEM
        acc = xc[0] * w_ref[wbase + co]
        for ci in range(1, c):
            acc = acc + xc[ci] * w_ref[wbase + ci * c + co]
        bias = c_out * b_ref[vbase + co] + cn_cout * beta_ref[vbase + co]  # (F,1)
        o_ref[:, co * hw:(co + 1) * hw] = (
            cin_cout_b * acc + c_skip_b * xc[co] + bias)


def _choose_frame_tile(half, frame_bytes, max_block_bytes=4 << 20):
    """Largest frame-count per block that (a) divides frames-per-half,
    (b) is a multiple of 8 (sublane constraint), (c) keeps the block within a
    v7x-safe VMEM budget (~4 MiB per buffered block)."""
    candidates = [t for t in range(8, half + 1, 8) if half % t == 0]
    if not candidates:
        # TODO(synk): pad the frame axis (or use a (N, C, H*W) 3-D block) when
        # frames-per-half is not a multiple of 8.
        raise ValueError(
            f"frames per half ({half}) must be a multiple of 8 for the "
            "lane-dense tiling")
    fitting = [t for t in candidates if t * frame_bytes <= max_block_bytes]
    return max(fitting) if fitting else min(candidates)


def _fused_denoise(sigma_f, x2d, w_flat, b_flat, beta_flat, *, hw, c):
    n, row = x2d.shape
    assert row == c * hw
    assert n % 2 == 0, "batch of frames must split into bad/good halves"
    half = n // 2

    frame_bytes = c * hw * 4
    f_tile = _choose_frame_tile(half, frame_bytes)
    tiles_per_half = half // f_tile
    grid = (2, tiles_per_half)          # axis 0: bad(0)/good(1), axis 1: tiles

    block_bytes = f_tile * frame_bytes
    # 2 streams (x in, out) x double buffering + sigma + slack; cap for v7x.
    vmem_limit = int(min(32 << 20, max(8 << 20, 5 * block_bytes)))

    row_map = lambda g, t: (g * tiles_per_half + t, 0)
    smem_spec = pl.BlockSpec(memory_space=pltpu.MemorySpace.SMEM)

    kernel = functools.partial(_denoiser_kernel, hw=hw, c=c)
    return pl.pallas_call(
        kernel,
        out_shape=jax.ShapeDtypeStruct((n, c * hw), jnp.float32),
        grid=grid,
        in_specs=[
            pl.BlockSpec((f_tile, 1), row_map),        # per-frame sigma
            pl.BlockSpec((f_tile, c * hw), row_map),   # frames (lane-dense)
            smem_spec,                                 # W  (resident, scalars)
            smem_spec,                                 # b
            smem_spec,                                 # beta
        ],
        out_specs=pl.BlockSpec((f_tile, c * hw), row_map),
        compiler_params=pltpu.CompilerParams(
            dimension_semantics=("parallel", "parallel"),
            vmem_limit_bytes=vmem_limit),
    )(sigma_f, x2d, w_flat, b_flat, beta_flat)


# ----------------------------------------------------------------------------
# Plain-JAX reference for the fused part (used only for self-checking)
# ----------------------------------------------------------------------------
def _reference_denoise(sigma_f, x2d, params, *, hw, c):
    n = x2d.shape[0]
    half = n // 2
    sd2 = SIGMA_DATA ** 2
    sig = sigma_f                                    # (N, 1)
    denom = sig * sig + sd2
    c_skip = sd2 / denom
    c_out = sig * SIGMA_DATA / jnp.sqrt(denom)
    c_in = 1.0 / jnp.sqrt(denom)
    c_noise = 0.25 * jnp.log(sig)

    x3 = x2d.reshape(n, c, hw)
    xs = x3 * c_in[:, :, None]

    def net(xs_h, cn_h, k):
        y = jnp.einsum('fip,ij->fjp', xs_h, params["w"][k])
        y = y + params["b"][k].reshape(1, c, 1)
        y = y + cn_h[:, :, None] * params["beta"][k].reshape(1, c, 1)
        return y

    bad = net(xs[:half], c_noise[:half], 0)
    good = net(xs[half:], c_noise[half:], 1)
    netout = jnp.concatenate([bad, good], axis=0)
    out3 = netout * c_out[:, :, None] + x3 * c_skip[:, :, None]
    return out3.reshape(n, c * hw)


# ----------------------------------------------------------------------------
# Module forward (glue + Pallas hot path)
# ----------------------------------------------------------------------------
def karras_temporal_multidiffusion_forward(
    x, sigma, params, *, num_overlap_frames, num_frames, n_skips,
    use_pallas=True):
    """x: (B, C, T, H, W) float32, sigma: (B,). Returns (B*T, C, H, W)."""
    T = num_frames
    if x.ndim == 5:
        B, C, T, H, W = x.shape
        # 'b c t h w -> (b t) c h w'
        x = jnp.transpose(x, (0, 2, 1, 3, 4)).reshape(B * T, C, H, W)
        if sigma.shape[0] != x.shape[0]:
            sigma = jnp.repeat(sigma, T)            # 'b -> (b t)'
    N, C, H, W = x.shape
    n_skips_eff = n_skips * N // T

    # '(b t) c h w -> b c t h w' and temporal-overlap averaging
    # (faithful to the reference's sequential in-place semantics; note that for
    #  valid integer n_skips >= 1 this loop range is empty, same as in PyTorch)
    xr = jnp.transpose(x.reshape(N // T, T, C, H, W), (0, 2, 1, 3, 4))
    nov = num_overlap_frames
    for i in range(xr.shape[0] - n_skips_eff):
        avg = 0.5 * (xr[i, :, -nov:] + xr[i + 1, :, :nov])
        xr = xr.at[i, :, -nov:].set(avg)
        xr = xr.at[i + n_skips_eff, :, :nov].set(avg)
    x = jnp.transpose(xr, (0, 2, 1, 3, 4)).reshape(N, C, H, W)

    # Lane-dense kernel layout: (N, C*H*W) is a pure reshape of NCHW (no
    # transpose, no extra HBM traffic).  sigma stays per-frame (N, 1).
    hw = H * W
    x2d = x.reshape(N, C * hw).astype(jnp.float32)
    sigma_f = sigma.astype(jnp.float32).reshape(N, 1)   # sigma must be > 0

    if use_pallas:
        w_flat = params["w"].reshape(-1).astype(jnp.float32)      # (2*C*C,)
        b_flat = params["b"].reshape(-1).astype(jnp.float32)      # (2*C,)
        beta_flat = params["beta"].reshape(-1).astype(jnp.float32)  # (2*C,)
        out2d = _fused_denoise(sigma_f, x2d, w_flat, b_flat, beta_flat,
                               hw=hw, c=C)
    else:
        out2d = _reference_denoise(sigma_f, x2d, params, hw=hw, c=C)

    # back to NCHW, shape (B*T, C, H, W) like the reference forward
    return out2d.reshape(N, C, H, W)
    # TODO(synk): `chunk_network` chunked invocation and dict cond / is_dub
    # masking are host-side batching glue around the external nn.Module and are
    # not representable as kernel compute; the single fused call covers the
    # non-chunked path's numerics.


# ----------------------------------------------------------------------------
if __name__ == "__main__":
    key = jax.random.PRNGKey(0)
    k1, k2, k3, k4, k5 = jax.random.split(key, 5)

    B, C, T, H, W = 2, 4, 8, 16, 16
    x = jax.random.normal(k1, (B, C, T, H, W), dtype=jnp.float32)
    # positive noise levels (one per batch element, repeated per frame inside)
    sigma = jnp.exp(jax.random.normal(k2, (B,), dtype=jnp.float32))

    # Deterministic synthetic network params: index 0 = bad_network, 1 = network
    params = {
        "w": 0.3 * jax.random.normal(k3, (2, C, C), dtype=jnp.float32),
        "b": 0.1 * jax.random.normal(k4, (2, 1, C), dtype=jnp.float32),
        "beta": 0.1 * jax.random.normal(k5, (2, 1, C), dtype=jnp.float32),
    }

    run = functools.partial(
        karras_temporal_multidiffusion_forward,
        num_overlap_frames=1, num_frames=T, n_skips=1)

    out = run(x, sigma, params, use_pallas=True)
    out = jax.block_until_ready(out)

    ref = run(x, sigma, params, use_pallas=False)
    ref = jax.block_until_ready(ref)

    assert out.shape == (B * T, C, H, W), out.shape
    assert jnp.allclose(out, ref, atol=1e-4, rtol=1e-4), (
        float(jnp.max(jnp.abs(out - ref))))

    print("KERNEL_OK")
</pallas_src>

<mosaic_0001>
module attributes {stable_mosaic.version = 11 : i64} {
  func.func @_denoiser_kernel(%arg0: i32, %arg1: i32, %arg2: memref<8x1xf32, #tpu.memory_space<vmem>>, %arg3: memref<8x1024xf32, #tpu.memory_space<vmem>>, %arg4: memref<32xf32, #tpu.memory_space<smem>>, %arg5: memref<8xf32, #tpu.memory_space<smem>>, %arg6: memref<8xf32, #tpu.memory_space<smem>>, %arg7: memref<8x1024xf32, #tpu.memory_space<vmem>>) attributes {dimension_semantics = [#tpu.dimension_semantics<parallel>, #tpu.dimension_semantics<parallel>], iteration_bounds = array<i64: 2, 1>, scalar_prefetch = 0 : i64, scratch_operands = 0 : i64, tpu.core_type = #tpu.core_type<tc>, window_params = [{transform_indices = @transform_0, window_bounds = array<i64: 8, 1>}, {transform_indices = @transform_1, window_bounds = array<i64: 8, 1024>}, {transform_indices = @transform_2, window_bounds = array<i64: 32>}, {transform_indices = @transform_3, window_bounds = array<i64: 8>}, {transform_indices = @transform_4, window_bounds = array<i64: 8>}, {transform_indices = @transform_5, window_bounds = array<i64: 8, 1024>}]} {
    %c0 = arith.constant 0 : index
    %c0_0 = arith.constant 0 : index
    %0 = vector.load %arg2[%c0, %c0_0] : memref<8x1xf32, #tpu.memory_space<vmem>>, vector<8x1xf32>
    %cst = arith.constant 5.000000e-01 : f32
    %cst_1 = arith.constant 5.000000e-01 : f32
    %1 = arith.mulf %cst, %cst_1 : f32
    %2 = arith.mulf %0, %0 : vector<8x1xf32>
    %3 = vector.broadcast %1 : f32 to vector<8x1xf32>
    %4 = arith.addf %2, %3 : vector<8x1xf32>
    %5 = math.rsqrt %4 : vector<8x1xf32>
    %6 = vector.broadcast %1 : f32 to vector<8x1xf32>
    %7 = arith.divf %6, %4 : vector<8x1xf32>
    %cst_2 = arith.constant 5.000000e-01 : f32
    %8 = vector.broadcast %cst_2 : f32 to vector<8x1xf32>
    %9 = arith.mulf %0, %8 : vector<8x1xf32>
    %10 = arith.mulf %9, %5 : vector<8x1xf32>
    %cst_3 = arith.constant 5.000000e-01 : f32
    %11 = vector.broadcast %cst_3 : f32 to vector<8x1xf32>
    %12 = arith.mulf %0, %11 : vector<8x1xf32>
    %13 = arith.divf %12, %4 : vector<8x1xf32>
    %14 = math.log %0 : vector<8x1xf32>
    %cst_4 = arith.constant 2.500000e-01 : f32
    %15 = vector.broadcast %cst_4 : f32 to vector<8x1xf32>
    %16 = arith.mulf %15, %14 : vector<8x1xf32>
    %17 = arith.mulf %16, %10 : vector<8x1xf32>
    %18 = vector.shape_cast %13 : vector<8x1xf32> to vector<8x1xf32>
    %19 = vector.broadcast %18 : vector<8x1xf32> to vector<8x256xf32>
    %20 = vector.shape_cast %7 : vector<8x1xf32> to vector<8x1xf32>
    %21 = vector.broadcast %20 : vector<8x1xf32> to vector<8x256xf32>
    %c0_5 = arith.constant 0 : index
    %c0_6 = arith.constant 0 : index
    %22 = vector.load %arg3[%c0_5, %c0_6] : memref<8x1024xf32, #tpu.memory_space<vmem>>, vector<8x256xf32>
    %c0_7 = arith.constant 0 : index
    %c256 = arith.constant 256 : index
    %23 = vector.load %arg3[%c0_7, %c256] : memref<8x1024xf32, #tpu.memory_space<vmem>>, vector<8x256xf32>
    %c0_8 = arith.constant 0 : index
    %c512 = arith.constant 512 : index
    %24 = vector.load %arg3[%c0_8, %c512] : memref<8x1024xf32, #tpu.memory_space<vmem>>, vector<8x256xf32>
    %c0_9 = arith.constant 0 : index
    %c768 = arith.constant 768 : index
    %25 = vector.load %arg3[%c0_9, %c768] : memref<8x1024xf32, #tpu.memory_space<vmem>>, vector<8x256xf32>
    %c16_i32 = arith.constant 16 : i32
    %26 = arith.muli %arg0, %c16_i32 : i32
    %c4_i32 = arith.constant 4 : i32
    %27 = arith.muli %arg0, %c4_i32 : i32
    %c0_i32 = arith.constant 0 : i32
    %28 = arith.addi %26, %c0_i32 : i32
    %29 = arith.index_cast %28 : i32 to index
    %30 = memref.load %arg4[%29] : memref<32xf32, #tpu.memory_space<smem>>
    %31 = vector.broadcast %30 : f32 to vector<8x256xf32>
    %32 = arith.mulf %22, %31 : vector<8x256xf32>
    %c4_i32_10 = arith.constant 4 : i32
    %33 = arith.addi %26, %c4_i32_10 : i32
    %c0_i32_11 = arith.constant 0 : i32
    %34 = arith.addi %33, %c0_i32_11 : i32
    %35 = arith.index_cast %34 : i32 to index
    %36 = memref.load %arg4[%35] : memref<32xf32, #tpu.memory_space<smem>>
    %37 = vector.broadcast %36 : f32 to vector<8x256xf32>
    %38 = arith.mulf %23, %37 : vector<8x256xf32>
    %39 = arith.addf %32, %38 : vector<8x256xf32>
    %c8_i32 = arith.constant 8 : i32
    %40 = arith.addi %26, %c8_i32 : i32
    %c0_i32_12 = arith.constant 0 : i32
    %41 = arith.addi %40, %c0_i32_12 : i32
    %42 = arith.index_cast %41 : i32 to index
    %43 = memref.load %arg4[%42] : memref<32xf32, #tpu.memory_space<smem>>
    %44 = vector.broadcast %43 : f32 to vector<8x256xf32>
    %45 = arith.mulf %24, %44 : vector<8x256xf32>
    %46 = arith.addf %39, %45 : vector<8x256xf32>
    %c12_i32 = arith.constant 12 : i32
    %47 = arith.addi %26, %c12_i32 : i32
    %c0_i32_13 = arith.constant 0 : i32
    %48 = arith.addi %47, %c0_i32_13 : i32
    %49 = arith.index_cast %48 : i32 to index
    %50 = memref.load %arg4[%49] : memref<32xf32, #tpu.memory_space<smem>>
    %51 = vector.broadcast %50 : f32 to vector<8x256xf32>
    %52 = arith.mulf %25, %51 : vector<8x256xf32>
    %53 = arith.addf %46, %52 : vector<8x256xf32>
    %c0_i32_14 = arith.constant 0 : i32
    %54 = arith.addi %27, %c0_i32_14 : i32
    %55 = arith.index_cast %54 : i32 to index
    %56 = memref.load %arg5[%55] : memref<8xf32, #tpu.memory_space<smem>>
    %57 = vector.broadcast %56 : f32 to vector<8x1xf32>
    %58 = arith.mulf %10, %57 : vector<8x1xf32>
    %c0_i32_15 = arith.constant 0 : i32
    %59 = arith.addi %27, %c0_i32_15 : i32
    %60 = arith.index_cast %59 : i32 to index
    %61 = memref.load %arg6[%60] : memref<8xf32, #tpu.memory_space<smem>>
    %62 = vector.broadcast %61 : f32 to vector<8x1xf32>
    %63 = arith.mulf %17, %62 : vector<8x1xf32>
    %64 = arith.addf %58, %63 : vector<8x1xf32>
    %65 = arith.mulf %19, %53 : vector<8x256xf32>
    %66 = arith.mulf %21, %22 : vector<8x256xf32>
    %67 = arith.addf %65, %66 : vector<8x256xf32>
    %68 = vector.broadcast %64 : vector<8x1xf32> to vector<8x256xf32>
    %69 = arith.addf %67, %68 : vector<8x256xf32>
    %c0_16 = arith.constant 0 : index
    %c0_17 = arith.constant 0 : index
    %70 = vector.load %arg7[%c0_16, %c0_17] : memref<8x1024xf32, #tpu.memory_space<vmem>>, vector<8x256xf32>
    tpu.vector_store %arg7[%c0_16, %c0_17], %69 {strides = array<i32>} : memref<8x1024xf32, #tpu.memory_space<vmem>>, vector<8x256xf32>,
    %c1_i32 = arith.constant 1 : i32
    %71 = arith.addi %26, %c1_i32 : i32
    %72 = arith.index_cast %71 : i32 to index
    %73 = memref.load %arg4[%72] : memref<32xf32, #tpu.memory_space<smem>>
    %74 = vector.broadcast %73 : f32 to vector<8x256xf32>
    %75 = arith.mulf %22, %74 : vector<8x256xf32>
    %c4_i32_18 = arith.constant 4 : i32
    %76 = arith.addi %26, %c4_i32_18 : i32
    %c1_i32_19 = arith.constant 1 : i32
    %77 = arith.addi %76, %c1_i32_19 : i32
    %78 = arith.index_cast %77 : i32 to index
    %79 = memref.load %arg4[%78] : memref<32xf32, #tpu.memory_space<smem>>
    %80 = vector.broadcast %79 : f32 to vector<8x256xf32>
    %81 = arith.mulf %23, %80 : vector<8x256xf32>
    %82 = arith.addf %75, %81 : vector<8x256xf32>
    %c8_i32_20 = arith.constant 8 : i32
    %83 = arith.addi %26, %c8_i32_20 : i32
    %c1_i32_21 = arith.constant 1 : i32
    %84 = arith.addi %83, %c1_i32_21 : i32
    %85 = arith.index_cast %84 : i32 to index
    %86 = memref.load %arg4[%85] : memref<32xf32, #tpu.memory_space<smem>>
    %87 = vector.broadcast %86 : f32 to vector<8x256xf32>
    %88 = arith.mulf %24, %87 : vector<8x256xf32>
    %89 = arith.addf %82, %88 : vector<8x256xf32>
    %c12_i32_22 = arith.constant 12 : i32
    %90 = arith.addi %26, %c12_i32_22 : i32
    %c1_i32_23 = arith.constant 1 : i32
    %91 = arith.addi %90, %c1_i32_23 : i32
    %92 = arith.index_cast %91 : i32 to index
    %93 = memref.load %arg4[%92] : memref<32xf32, #tpu.memory_space<smem>>
    %94 = vector.broadcast %93 : f32 to vector<8x256xf32>
    %95 = arith.mulf %25, %94 : vector<8x256xf32>
    %96 = arith.addf %89, %95 : vector<8x256xf32>
    %c1_i32_24 = arith.constant 1 : i32
    %97 = arith.addi %27, %c1_i32_24 : i32
    %98 = arith.index_cast %97 : i32 to index
    %99 = memref.load %arg5[%98] : memref<8xf32, #tpu.memory_space<smem>>
    %100 = vector.broadcast %99 : f32 to vector<8x1xf32>
    %101 = arith.mulf %10, %100 : vector<8x1xf32>
    %c1_i32_25 = arith.constant 1 : i32
    %102 = arith.addi %27, %c1_i32_25 : i32
    %103 = arith.index_cast %102 : i32 to index
    %104 = memref.load %arg6[%103] : memref<8xf32, #tpu.memory_space<smem>>
    %105 = vector.broadcast %104 : f32 to vector<8x1xf32>
    %106 = arith.mulf %17, %105 : vector<8x1xf32>
    %107 = arith.addf %101, %106 : vector<8x1xf32>
    %108 = arith.mulf %19, %96 : vector<8x256xf32>
    %109 = arith.mulf %21, %23 : vector<8x256xf32>
    %110 = arith.addf %108, %109 : vector<8x256xf32>
    %111 = vector.broadcast %107 : vector<8x1xf32> to vector<8x256xf32>
    %112 = arith.addf %110, %111 : vector<8x256xf32>
    %c0_26 = arith.constant 0 : index
    %c256_27 = arith.constant 256 : index
    %113 = vector.load %arg7[%c0_26, %c256_27] : memref<8x1024xf32, #tpu.memory_space<vmem>>, vector<8x256xf32>
    tpu.vector_store %arg7[%c0_26, %c256_27], %112 {strides = array<i32>} : memref<8x1024xf32, #tpu.memory_space<vmem>>, vector<8x256xf32>,
    %c2_i32 = arith.constant 2 : i32
    %114 = arith.addi %26, %c2_i32 : i32
    %115 = arith.index_cast %114 : i32 to index
    %116 = memref.load %arg4[%115] : memref<32xf32, #tpu.memory_space<smem>>
    %117 = vector.broadcast %116 : f32 to vector<8x256xf32>
    %118 = arith.mulf %22, %117 : vector<8x256xf32>
    %c4_i32_28 = arith.constant 4 : i32
    %119 = arith.addi %26, %c4_i32_28 : i32
    %c2_i32_29 = arith.constant 2 : i32
    %120 = arith.addi %119, %c2_i32_29 : i32
    %121 = arith.index_cast %120 : i32 to index
    %122 = memref.load %arg4[%121] : memref<32xf32, #tpu.memory_space<smem>>
    %123 = vector.broadcast %122 : f32 to vector<8x256xf32>
    %124 = arith.mulf %23, %123 : vector<8x256xf32>
    %125 = arith.addf %118, %124 : vector<8x256xf32>
    %c8_i32_30 = arith.constant 8 : i32
    %126 = arith.addi %26, %c8_i32_30 : i32
    %c2_i32_31 = arith.constant 2 : i32
    %127 = arith.addi %126, %c2_i32_31 : i32
    %128 = arith.index_cast %127 : i32 to index
    %129 = memref.load %arg4[%128] : memref<32xf32, #tpu.memory_space<smem>>
    %130 = vector.broadcast %129 : f32 to vector<8x256xf32>
    %131 = arith.mulf %24, %130 : vector<8x256xf32>
    %132 = arith.addf %125, %131 : vector<8x256xf32>
    %c12_i32_32 = arith.constant 12 : i32
    %133 = arith.addi %26, %c12_i32_32 : i32
    %c2_i32_33 = arith.constant 2 : i32
    %134 = arith.addi %133, %c2_i32_33 : i32
    %135 = arith.index_cast %134 : i32 to index
    %136 = memref.load %arg4[%135] : memref<32xf32, #tpu.memory_space<smem>>
    %137 = vector.broadcast %136 : f32 to vector<8x256xf32>
    %138 = arith.mulf %25, %137 : vector<8x256xf32>
    %139 = arith.addf %132, %138 : vector<8x256xf32>
    %c2_i32_34 = arith.constant 2 : i32
    %140 = arith.addi %27, %c2_i32_34 : i32
    %141 = arith.index_cast %140 : i32 to index
    %142 = memref.load %arg5[%141] : memref<8xf32, #tpu.memory_space<smem>>
    %143 = vector.broadcast %142 : f32 to vector<8x1xf32>
    %144 = arith.mulf %10, %143 : vector<8x1xf32>
    %c2_i32_35 = arith.constant 2 : i32
    %145 = arith.addi %27, %c2_i32_35 : i32
    %146 = arith.index_cast %145 : i32 to index
    %147 = memref.load %arg6[%146] : memref<8xf32, #tpu.memory_space<smem>>
    %148 = vector.broadcast %147 : f32 to vector<8x1xf32>
    %149 = arith.mulf %17, %148 : vector<8x1xf32>
    %150 = arith.addf %144, %149 : vector<8x1xf32>
    %151 = arith.mulf %19, %139 : vector<8x256xf32>
    %152 = arith.mulf %21, %24 : vector<8x256xf32>
    %153 = arith.addf %151, %152 : vector<8x256xf32>
    %154 = vector.broadcast %150 : vector<8x1xf32> to vector<8x256xf32>
    %155 = arith.addf %153, %154 : vector<8x256xf32>
    %c0_36 = arith.constant 0 : index
    %c512_37 = arith.constant 512 : index
    %156 = vector.load %arg7[%c0_36, %c512_37] : memref<8x1024xf32, #tpu.memory_space<vmem>>, vector<8x256xf32>
    tpu.vector_store %arg7[%c0_36, %c512_37], %155 {strides = array<i32>} : memref<8x1024xf32, #tpu.memory_space<vmem>>, vector<8x256xf32>,
    %c3_i32 = arith.constant 3 : i32
    %157 = arith.addi %26, %c3_i32 : i32
    %158 = arith.index_cast %157 : i32 to index
    %159 = memref.load %arg4[%158] : memref<32xf32, #tpu.memory_space<smem>>
    %160 = vector.broadcast %159 : f32 to vector<8x256xf32>
    %161 = arith.mulf %22, %160 : vector<8x256xf32>
    %c4_i32_38 = arith.constant 4 : i32
    %162 = arith.addi %26, %c4_i32_38 : i32
    %c3_i32_39 = arith.constant 3 : i32
    %163 = arith.addi %162, %c3_i32_39 : i32
    %164 = arith.index_cast %163 : i32 to index
    %165 = memref.load %arg4[%164] : memref<32xf32, #tpu.memory_space<smem>>
    %166 = vector.broadcast %165 : f32 to vector<8x256xf32>
    %167 = arith.mulf %23, %166 : vector<8x256xf32>
    %168 = arith.addf %161, %167 : vector<8x256xf32>
    %c8_i32_40 = arith.constant 8 : i32
    %169 = arith.addi %26, %c8_i32_40 : i32
    %c3_i32_41 = arith.constant 3 : i32
    %170 = arith.addi %169, %c3_i32_41 : i32
    %171 = arith.index_cast %170 : i32 to index
    %172 = memref.load %arg4[%171] : memref<32xf32, #tpu.memory_space<smem>>
    %173 = vector.broadcast %172 : f32 to vector<8x256xf32>
    %174 = arith.mulf %24, %173 : vector<8x256xf32>
    %175 = arith.addf %168, %174 : vector<8x256xf32>
    %c12_i32_42 = arith.constant 12 : i32
    %176 = arith.addi %26, %c12_i32_42 : i32
    %c3_i32_43 = arith.constant 3 : i32
    %177 = arith.addi %176, %c3_i32_43 : i32
    %178 = arith.index_cast %177 : i32 to index
    %179 = memref.load %arg4[%178] : memref<32xf32, #tpu.memory_space<smem>>
    %180 = vector.broadcast %179 : f32 to vector<8x256xf32>
    %181 = arith.mulf %25, %180 : vector<8x256xf32>
    %182 = arith.addf %175, %181 : vector<8x256xf32>
    %c3_i32_44 = arith.constant 3 : i32
    %183 = arith.addi %27, %c3_i32_44 : i32
    %184 = arith.index_cast %183 : i32 to index
    %185 = memref.load %arg5[%184] : memref<8xf32, #tpu.memory_space<smem>>
    %186 = vector.broadcast %185 : f32 to vector<8x1xf32>
    %187 = arith.mulf %10, %186 : vector<8x1xf32>
    %c3_i32_45 = arith.constant 3 : i32
    %188 = arith.addi %27, %c3_i32_45 : i32
    %189 = arith.index_cast %188 : i32 to index
    %190 = memref.load %arg6[%189] : memref<8xf32, #tpu.memory_space<smem>>
    %191 = vector.broadcast %190 : f32 to vector<8x1xf32>
    %192 = arith.mulf %17, %191 : vector<8x1xf32>
    %193 = arith.addf %187, %192 : vector<8x1xf32>
    %194 = arith.mulf %19, %182 : vector<8x256xf32>
    %195 = arith.mulf %21, %25 : vector<8x256xf32>
    %196 = arith.addf %194, %195 : vector<8x256xf32>
    %197 = vector.broadcast %193 : vector<8x1xf32> to vector<8x256xf32>
    %198 = arith.addf %196, %197 : vector<8x256xf32>
    %c0_46 = arith.constant 0 : index
    %c768_47 = arith.constant 768 : index
    %199 = vector.load %arg7[%c0_46, %c768_47] : memref<8x1024xf32, #tpu.memory_space<vmem>>, vector<8x256xf32>
    tpu.vector_store %arg7[%c0_46, %c768_47], %198 {strides = array<i32>} : memref<8x1024xf32, #tpu.memory_space<vmem>>, vector<8x256xf32>,
    return
  }
  func.func @transform_0(%arg0: i32, %arg1: i32) -> (i32, i32) {
    %c1_i32 = arith.constant 1 : i32
    %0 = arith.muli %arg0, %c1_i32 : i32
    %1 = arith.addi %0, %arg1 : i32
    %c0_i32 = arith.constant 0 : i32
    %c0_i32_0 = arith.constant 0 : i32
    return %1, %c0_i32 : i32, i32
  }
  func.func @transform_1(%arg0: i32, %arg1: i32) -> (i32, i32) {
    %c1_i32 = arith.constant 1 : i32
    %0 = arith.muli %arg0, %c1_i32 : i32
    %1 = arith.addi %0, %arg1 : i32
    %c0_i32 = arith.constant 0 : i32
    %c0_i32_0 = arith.constant 0 : i32
    return %1, %c0_i32 : i32, i32
  }
  func.func @transform_2(%arg0: i32, %arg1: i32) -> i32 {
    %c0_i32 = arith.constant 0 : i32
    %c0_i32_0 = arith.constant 0 : i32
    return %c0_i32 : i32
  }
  func.func @transform_3(%arg0: i32, %arg1: i32) -> i32 {
    %c0_i32 = arith.constant 0 : i32
    %c0_i32_0 = arith.constant 0 : i32
    return %c0_i32 : i32
  }
  func.func @transform_4(%arg0: i32, %arg1: i32) -> i32 {
    %c0_i32 = arith.constant 0 : i32
    %c0_i32_0 = arith.constant 0 : i32
    return %c0_i32 : i32
  }
  func.func @transform_5(%arg0: i32, %arg1: i32) -> (i32, i32) {
    %c1_i32 = arith.constant 1 : i32
    %0 = arith.muli %arg0, %c1_i32 : i32
    %1 = arith.addi %0, %arg1 : i32
    %c0_i32 = arith.constant 0 : i32
    %c0_i32_0 = arith.constant 0 : i32
    return %1, %c0_i32 : i32, i32
  }
}

</mosaic_0001>

<bundles_post_ra>
// kernel: tpu_custom_call.1
= control target key start
LH: loop header
LB: loop body
LE: loop exit
PB: predicated region body
PF: predicated region fallthrough
CT: control target
= control target key end

     0   :  { %s1376_s0 = inlined_call_operand.vmem [shape: f32[16,1], index: 0, kind: input, shape index: {}]   ;;  %s1377_s1 = inlined_call_operand.hbm [shape: f32[16,1024], index: 1, kind: input, shape index: {}]   ;;  %s1378_s2 = inlined_call_operand.vmem [shape: f32[32], index: 2, kind: input, shape index: {}]   ;;  %s1379_s3 = inlined_call_operand.vmem [shape: f32[8], index: 3, kind: input, shape index: {}]   ;;  %s1380_s4 = inlined_call_operand.vmem [shape: f32[8], index: 4, kind: input, shape index: {}]   ;;  %s1381_s5 = inlined_call_operand.hbm [shape: f32[16,1024], index: 5, kind: output, shape index: {}]  }
   0x1   :  { %1383 = sst [smem:[#allocation15_spill]] %s1376_s0 }
   0x2   :  { %1384 = sst [smem:[#allocation16_spill]] %s1377_s1 }
   0x3   :  { %1385 = sst [smem:[#allocation17_spill]] %s1378_s2 }
   0x4   :  { %1386 = sst [smem:[#allocation18_spill]] %s1379_s3 }
   0x5   :  { %1387 = sst [smem:[#allocation19_spill]] %s1380_s4 }
   0x6   :  { %10 = vsyncpa [#allocation3], 0 }
   0x7   :  { %12 = vsyncpa [#allocation3 + $0x1], 0 }
   0x8   :  { %13 = vsyncpa [#allocation5], 0 }
   0x9   :  { %14 = vsyncpa [#allocation8], 0 }
   0xa   :  { %15 = vsyncpa [#allocation4], 0 }
   0xb   :  { %17 = vsyncpa [#allocation4 + $0x1], 0  ;;  %s1045_s18 = smov 0   ;;  %s1047_s19 = smov 0  }
   0xc   :  { %s1049_s20 = smov 0   ;;  %s1051_s21 = smov 0  }
   0xd   :  { %s1053_s22 = smov 0   ;;  %s1055_s23 = smov 0  }
   0xe LB: > { %s715_s24 = sadd.s32 4294967295, %s1009_s23   ;;  %s716_s25 = sadd.s32 4294967294, %s1009_s23   ;;  %s1009_s23 = sphi %s1055_s23, %s23_s23   ;;  %s1005_s22 = sphi %s1053_s22, %s1407_s22   ;;  %s1001_s21 = sphi %s1051_s21, %s1406_s21   ;;  %s997_s20 = sphi %s1049_s20, %s1405_s20   ;;  %s993_s19 = sphi %s1047_s19, %s1404_s19   ;;  %s989_s18 = sphi %s1045_s18, %s1403_s18  }
   0xf   : > { %p85_p0 = scmp.ne.s32.totalorder %s993_s19, %s989_s18  ;;  %p1079_p1 = scmp.eq.s32.totalorder %s715_s24, 0 }
  0x10   : > { %p1083_p2 = scmp.eq.s32.totalorder %s715_s24, 1  ;;  %p180_p3 = scmp.eq.s32.totalorder %s716_s25, 1 }
  0x11   : > { %p1089_p4 = por %p1079_p1, %p85_p0  ;;  %p717_p5 = scmp.ge.s32.totalorder %s1009_s23, 1 }
  0x12   : > { %p1094_p6 = por %p180_p3, %p85_p0  ;;  %p187_p7 = scmp.lt.s32.totalorder %s1009_s23, 3 }
  0x13   : > { %s1392_s3 = sld [smem:[#allocation18_spill]]  ;;  %p721_p9 = scmp.ge.s32.totalorder %s1009_s23, 2 }
  0x14   : > { %p1102_p8 = pnand %p717_p5, %p187_p7  ;;  %s1394_s2 = sld [smem:[#allocation17_spill]] }
  0x15   : > { %s1395_s4 = sld [smem:[#allocation19_spill]]  ;;  %s1011_s15 = smov [#allocation7]  }
  0x16   : > { %p757_p10 = pneg %p1102_p8  ;;  %s1012_s16 = smov [#allocation6]  }
  0x17   : > { %s1013_s17 = smov [#allocation9]   ;;  %s72_s24 = sadd.s32 1, %s997_s20 }
  0x18   : > { %p758_p11 = pnand %p757_p10, %p1079_p1  ;;  %s35_s25 = sadd.s32 1, %s1005_s22 }
  0x19   : > { %s209_s7 = sshll.u32 %s1392_s3, 4  ;;  %p79_p12 = scmp.ne.s32.totalorder %s997_s20, %s993_s19  ;;  %s210_s7 = int_to_ptr.vmem [resolvable:$true] %s209_s7 }
  0x1a   : > { %s199_s11 = sshll.u32 %s1394_s2, 4  ;;  %p37_p13 = scmp.ge.s32.totalorder %s35_s25, 2  ;;  %s200_s11 = int_to_ptr.vmem [resolvable:$true] %s199_s11 }
  0x1b   : > { %s219_s14 = sshll.u32 %s1395_s4, 4  ;;  %p80_p0 = scmp.eq.s32.totalorder %s1009_s23, 0  ;;  %s220_s14 = int_to_ptr.vmem [resolvable:$true] %s219_s14 }
  0x1c   : > { %763 = dma.vmem_to_smem (!%p758_p11), %s210_s7, 16, %s1011_s15, [#allocation8]  }
  0x1d   : > { %760 = dma.vmem_to_smem (!%p758_p11), %s200_s11, 16, %s1012_s16, [#allocation5]  }
  0x1e   : > { %766 = dma.vmem_to_smem (!%p758_p11), %s220_s14, 16, %s1013_s17, [#allocation8]  }
  0x1f   : > { %p1124_p3 = por %p1083_p2, %p79_p12  ;;  %p778_p5 = scmp.lt.s32.totalorder %s1009_s23, 2 }
  0x20   : > { %s1409_s25 = smov (%p37_p13, %s35_s25), 0  ;;  %p1131_p7 = por %p80_p0, %p79_p12 }
  0x21   : > { %s239_s7 = sand.u32 1, %s997_s20   ;;  %s69_s9 = ssub.s32 %s1005_s22, %s1409_s25 }
  0x22   : > { %p70_p10 = scmp.eq.s32.totalorder %s69_s9, 0  ;;  %s722_s10 = sshll.u32 %s239_s7, 6 }
  0x23   : > { %s739_s11 = sshll.u32 %s1005_s22, 6  ;;  %s1398_s1 = sld [smem:[#allocation16_spill]] }
  0x24   : > { %s1140_s27 = scalar_select %p70_p10, %s997_s20, %s72_s24  }
  0x25   : > { %s243_s15 = scalar_lea.vmem [#allocation2], %s722_s10  ;;  %p768_p2 = pnand %p778_p5, %p1131_p7 }
  0x26   : > { %s253_s16 = sshll.u32 %s243_s15, 4  ;;  %s240_s2 = scalar_lea.sflag [#allocation3], %s239_s7  ;;  %s254_s16 = int_to_ptr.vmem [resolvable:$true] %s253_s16 }
  0x27   : > { %262 = sbr.rel (%p1102_p8) target bundleno = 221 (0xdd), region = 40  ;;  %s1152_s24 = sand.u32 (!%p1102_p8), 1, %s993_s19  }
  0x28   : > { %s1382_s9 = sshll.u32 (!%p1102_p8), %s1152_s24, 6  ;;  %s265_s10 = scalar_lea.sflag (!%p1102_p8), [#allocation3], %s1152_s24 }
  0x29   : > { %s249_s14 = scalar_lea.hbm %s1398_s1, %s739_s11  ;;  %s1158_s11 = scalar_lea.vmem (!%p1102_p8), [#allocation2], %s1382_s9 }
  0x2a   : > { %s251_s17 = sshll.u32 %s249_s14, 4  ;;  %s252_s17 = int_to_ptr.hbm [resolvable:$true] %s251_s17 }
  0x2b   : > { %770 = dma.hbm_to_vmem [thread:$0]  (!%p768_p2), %s252_s17, 1024, %s254_s16, %s240_s2  }
  0x2c   : > { %972 = dma.done.wait (%p1089_p4), %s265_s10, 1024  }
  0x2d   : > { %974 = vsyncadd (%p1089_p4), %s265_s10, 4294966272 }
  0x2e   : > { %976 = dma.done.wait (%p1079_p1), [#allocation5], 16  }
  0x2f   : > { %978 = vsyncadd (%p1079_p1), [#allocation5], 4294967280 }
  0x30   : > { %980 = dma.done.wait (%p1079_p1), [#allocation8], 32  }
  0x31   : > { %982 = vsyncadd (%p1079_p1), [#allocation8], 4294967264 }
  0x32   : > { %289 = sfence }
  0x33   : > { %p318_p8 = scmp.lt.s32.totalorder %s1001_s21, 1  ;;  %v1014_v0 = vmov 0   ;;  %s1399_s0 = sld [smem:[#allocation15_spill]]  ;;  %v1241_v50 = vld [vmem:[%s1158_s11] sm:$0xff]  ;;  %v1244_v51 = vld [vmem:[%s1158_s11 + $0x10] sm:$0xff]  ;;  %v1250_v54 = vld [vmem:[%s1158_s11 + $0x8] sm:$0xff] }
  0x34   : > { %835 = vset.pattern.permute.xlu0 %v1014_v0  ;;  %836 = vset.pattern.permute.xlu1 %v1014_v0  ;;  %s1178_s26 = sshll.u32 %s1001_s21, 2  ;;  %v1253_v55 = vld [vmem:[%s1158_s11 + $0x18] sm:$0xff]  ;;  %v1267_v59 = vld [vmem:[%s1158_s11 + $0x20] sm:$0xff]  ;;  %v1270_v60 = vld [vmem:[%s1158_s11 + $0x28] sm:$0xff] }
  0x35   : > { %s319_s2 = scalar_select %p318_p8, %s1001_s21, 1  ;;  %837 = vset.pattern.permute.xlu2 %v1014_v0 }
  0x36   : > { %s502_s12 = sadd.s32 2, %s1178_s26  ;;  %s1182_s13 = sld [smem:[#allocation7 + %s1178_s26]] }
  0x37   : > { %s731_s28 = sshll.u32 %s319_s2, 3  ;;  %s1184_s14 = sld [smem:[#allocation7 + %s502_s12]] }
  0x38   : > { %s1187_s15 = sld [smem:[#allocation9 + %s1178_s26]]  ;;  %s453_s16 = sadd.s32 1, %s1178_s26 }
  0x39   : > { %s321_s7 = scalar_lea.vmem %s1399_s0, %s731_s28  ;;  %s506_s17 = sld [smem:[#allocation9 + %s502_s12]] }
  0x3a   : > { %v325_v1 = vld [vmem:[%s321_s7] sm:$0xff]  ;;  %s551_s10 = sadd.s32 3, %s1178_s26  ;;  %s1196_s2 = sld [smem:[#allocation7 + %s453_s16]] }
  0x3b   : > { %v326_v2 = vmul.f32 %v325_v1, %v325_v1  ;;  %v353_v18 = vmul.f32 0.5, %v325_v1  ;;  %s457_s28 = sld [smem:[#allocation9 + %s453_s16]]  ;;  %s1206_s7 = sshll.u32 %s1001_s21, 4 }
  0x3c   : > { %s552_s8 = sld [smem:[#allocation7 + %s551_s10]]  ;;  %v406_v27 = vstv %s1182_s13  ;;  %s384_s26 = sadd.s32 4, %s1206_s7 }
  0x3d   : > { %v327_v3 = vadd.f32 0.25, %v326_v2  ;;  %s555_s6 = sld [smem:[#allocation9 + %s551_s10]]  ;;  %v504_v28 = vstv %s1184_s14  ;;  %s391_s12 = sadd.s32 8, %s1206_s7 }
  0x3e   : > { %v409_v30 = vstv %s1187_s15  ;;  %s1211_s13 = sld [smem:[#allocation6 + %s1206_s7]]  ;;  %s427_s14 = sadd.s32 1, %s1206_s7 }
  0x3f   : > { %838 = vrcp.f32 %v327_v3  ;;  %v349_v7 = vand.u32 2147483648, %v327_v3  ;;  %vm334_vm0 = vweird.f32 %v327_v3  ;;  %v347_v10 = vand.u32 2147483647, %v327_v3  ;;  %s1214_s15 = sld [smem:[#allocation6 + %s384_s26]]  ;;  %s432_s16 = sadd.s32 5, %s1206_s7 }
  0x40   : > { %840 = vrsqrt.f32 %v327_v3  ;;  %v507_v31 = vstv %s506_s17  ;;  %v455_v38 = vstv %s1196_s2  ;;  %s1217_s17 = sld [smem:[#allocation6 + %s391_s12]]  ;;  %s476_s10 = sadd.s32 2, %s1206_s7 }
  0x41   : > { %842 = vlog2.f32 %v325_v1  ;;  %v350_v15 = vor.u32 1.1754944e-38, %v349_v7  ;;  %vm348_vm4 = vcmp.eq.f32.partialorder %v347_v10, 8.507059e+37  ;;  %v458_v39 = vstv %s457_s28  ;;  %s1220_s2 = sld [smem:[#allocation6 + %s427_s14]]  ;;  %s481_s28 = sadd.s32 6, %s1206_s7 }
  0x42   : > { %v553_v42 = vstv %s552_s8  ;;  %s1223_s8 = sld [smem:[#allocation6 + %s432_s16]]  ;;  %s530_s9 = sadd.s32 7, %s1206_s7 }
  0x43   : > { %v556_v43 = vstv %s555_s6  ;;  %s525_s6 = sadd.s32 3, %s1206_s7  ;;  %s1226_s26 = sld [smem:[#allocation6 + %s476_s10]] }
  0x44   : > { %s398_s0 = sadd.s32 12, %s1206_s7  ;;  %s1230_s12 = sld [smem:[#allocation6 + %s481_s28]]  ;;  %v381_v52 = vstv %s1211_s13 }
  0x45   : > { %v839_v4 = vpop.eup %838  ;;  %s1232_s1 = sld [smem:[#allocation6 + %s525_s6]]  ;;  %s488_s3 = sadd.s32 10, %s1206_s7  ;;  %v386_v53 = vstv %s1214_s15  ;;  %v382_v56 = vmul.f32 %v381_v52, %v1241_v50  ;;  %v383_v61 = vmul.f32 %v381_v52, %v1250_v54 }
  0x46   : > { %v841_v5 = vpop.eup %840  ;;  %v339_v6 = vmul.f32 %v839_v4, %v327_v3  ;;  %vm344_vm1 = vweird.f32 %v839_v4  ;;  %s1235_s14 = sld [smem:[#allocation6 + %s530_s9]]  ;;  %s537_s16 = sadd.s32 11, %s1206_s7  ;;  %v387_v57 = vmul.f32 %v386_v53, %v1244_v51  ;;  %v388_v62 = vmul.f32 %v386_v53, %v1253_v55 }
  0x47   : > { %v329_v8 = vmul.f32 %v841_v5, %v327_v3  ;;  %v843_v11 = vpop.eup %842  ;;  %vm1191_vm2 = vmor %vm334_vm0, %vm344_vm1  ;;  %vm335_vm3 = vweird.f32 %v841_v5  ;;  %s1237_s4 = sld [smem:[#allocation6 + %s398_s0]]  ;;  %s439_s10 = sadd.s32 9, %s1206_s7  ;;  %v429_v58 = vstv %s1220_s2  ;;  %v393_v63 = vstv %s1217_s17 }
  0x48   : > { %v340_v9 = vsub.f32 1.0, %v339_v6  ;;  %v357_v19 = vmul.f32 0.6931472, %v843_v11  ;;  %vm336_vm5 = vmor %vm334_vm0, %vm335_vm3  ;;  %s1255_s0 = sld [smem:[#allocation6 + %s488_s3]]  ;;  %s495_s9 = sadd.s32 14, %s1206_s7  ;;  %v430_v2 = vmul.f32 %v429_v58, %v1241_v50  ;;  %v434_v3 = vstv %s1223_s8  ;;  %v1287_v6 = vld [vmem:[%s1158_s11 + $0x30] sm:$0xff] }
  0x49   : > { %v330_v12 = vmul.f32 %v841_v5, %v329_v8  ;;  %s1258_s28 = sld [smem:[#allocation6 + %s537_s16]]  ;;  %s544_s15 = sadd.s32 15, %s1206_s7  ;;  %v478_v0 = vstv %s1226_s26  ;;  %v389_v7 = vadd.f32 %v387_v57, %v382_v56  ;;  %v394_v8 = vmul.f32 %v393_v63, %v1267_v59  ;;  %v1295_v11 = vld [vmem:[%s1158_s11 + $0x38] sm:$0xff] }
  0x4a   : > { %v341_v13 = vmul.f32 %v839_v4, %v340_v9  ;;  %v358_v25 = vmul.f32 0.25, %v357_v19  ;;  %s1263_s13 = sld [smem:[#allocation6 + %s439_s10]]  ;;  %s446_s3 = sadd.s32 13, %s1206_s7  ;;  %v483_v1 = vstv %s1230_s12  ;;  %v395_v9 = vmul.f32 %v393_v63, %v1270_v60 }
  0x4b   : > { %v331_v16 = vmul.f32 0.5, %v330_v12  ;;  %s1278_s6 = sld [smem:[#allocation6 + %s495_s9]]  ;;  %v390_v12 = vadd.f32 %v388_v62, %v383_v61  ;;  %v479_v14 = vmul.f32 %v478_v0, %v1241_v50 }
  0x4c   : > { %v342_v17 = vadd.f32 %v839_v4, %v341_v13  ;;  %s1284_s2 = sld [smem:[#allocation6 + %s544_s15]]  ;;  %v431_v13 = vmul.f32 %v429_v58, %v1250_v54 }
  0x4d   : > { %v332_v20 = vsub.f32 1.5, %v331_v16  ;;  %v400_v10 = vstv %s1237_s4  ;;  %s1292_s7 = sld [smem:[#allocation6 + %s446_s3]]  ;;  %v435_v16 = vmul.f32 %v434_v3, %v1244_v51 }
  0x4e   : > { %v346_v21 = vsel %vm1191_vm2, %v839_v4, %v342_v17  ;;  %v527_v4 = vstv %s1232_s1  ;;  %v490_v17 = vstv %s1255_s0  ;;  %s740_s1 = sshll.u32 %s1001_s21, 6  ;;  %s1402_s21 = sshll.u32 %s1152_s24, 6 }
  0x4f   : > { %v351_v22 = vsel %vm348_vm4, %v350_v15, %v346_v21  ;;  %v333_v23 = vmul.f32 %v841_v5, %v332_v20  ;;  %v484_v15 = vmul.f32 %v483_v1, %v1244_v51  ;;  %v401_v20 = vmul.f32 %v400_v10, %v1287_v6  ;;  %s587_s17 = scalar_lea.hbm %s1381_s5, %s740_s1  ;;  %s316_s8 = scalar_lea.vmem [#allocation10], %s1402_s21 }
  0x50   : > { %v355_v24 = vmul.f32 %v353_v18, %v351_v22  ;;  %v352_v35 = vmul.f32 0.25, %v351_v22  ;;  %v529_v21 = vmul.f32 %v527_v4, %v1250_v54  ;;  %s589_s26 = sshll.u32 %s316_s8, 4  ;;  %s591_s12 = sshll.u32 %s587_s17, 4  ;;  %s590_s26 = int_to_ptr.vmem [resolvable:$true] %s589_s26  ;;  %s592_s12 = int_to_ptr.hbm [resolvable:$true] %s591_s12 }
  0x51   : > { %v337_v26 = vsel %vm336_vm5, %v841_v5, %v333_v23  ;;  %v532_v5 = vstv %s1235_s14  ;;  %v539_v23 = vstv %s1258_s28  ;;  %s575_s14 = scalar_lea.sflag [#allocation4], %s1152_s24  ;;  %s933_s16 = sshra.s32 %s592_s12, 4  ;;  %s934_s16 = int_to_ptr.hbm [resolvable:$true] %s933_s16 }
  0x52   : > { %362 = vperm.xlu0 %835, %v355_v24   ;;  %v354_v29 = vmul.f32 %v353_v18, %v337_v26  ;;  %v528_v18 = vmul.f32 %v527_v4, %v1241_v50  ;;  %v533_v19 = vmul.f32 %v532_v5, %v1244_v51  ;;  %v534_v22 = vmul.f32 %v532_v5, %v1253_v55  ;;  %s935_s10 = scalar_lea.hbm %s934_s16, 64  ;;  %s939_s28 = scalar_lea.hbm %s1381_s5, 128 }
  0x53   : > { %v396_v24 = vadd.f32 %v394_v8, %v389_v7  ;;  %v436_v26 = vmul.f32 %v434_v3, %v1253_v55  ;;  %p936_p1 = scmp.ne.s32.totalorder %s934_s16, %s935_s10  ;;  %p940_p12 = scmp.lt.s32.totalorder %s934_s16, %s1381_s5 }
  0x54   : > { %v359_v32 = vmul.f32 %v358_v25, %v354_v29  ;;  %v407_v33 = vmul.f32 %v406_v27, %v354_v29  ;;  %v505_v34 = vmul.f32 %v504_v28, %v354_v29  ;;  %v456_v44 = vmul.f32 %v455_v38, %v354_v29  ;;  %p941_p13 = scmp.lt.s32.totalorder %s939_s28, %s935_s10 }
  0x55   : > { %v554_v46 = vmul.f32 %v553_v42, %v354_v29  ;;  %v402_v25 = vmul.f32 %v400_v10, %v1295_v11  ;;  %v441_v27 = vstv %s1263_s13  ;;  %v480_v28 = vmul.f32 %v478_v0, %v1250_v54  ;;  %p937_p4 = pnand %p936_p1, %p1124_p3 }
  0x56   : > { %v410_v36 = vmul.f32 %v409_v30, %v359_v32  ;;  %v508_v37 = vmul.f32 %v507_v31, %v359_v32  ;;  %v459_v45 = vmul.f32 %v458_v39, %v359_v32  ;;  %v557_v47 = vmul.f32 %v556_v43, %v359_v32  ;;  %p942_p0 = por %p941_p13, %p940_p12 }
  0x57   : > { %v485_v29 = vmul.f32 %v483_v1, %v1253_v55  ;;  %v486_v30 = vadd.f32 %v484_v15, %v479_v14  ;;  %v491_v31 = vmul.f32 %v490_v17, %v1267_v59  ;;  %v397_v32 = vadd.f32 %v395_v9, %v390_v12  ;;  %p938_p11 = pneg %p937_p4 }
  0x58   : > { %v411_v40 = vadd.f32 %v410_v36, %v407_v33  ;;  %v509_v41 = vadd.f32 %v508_v37, %v505_v34  ;;  %v460_v48 = vadd.f32 %v459_v45, %v456_v44  ;;  %v558_v49 = vadd.f32 %v557_v47, %v554_v46 }
  0x59   : > { %v497_v33 = vstv %s1278_s6  ;;  %v535_v34 = vadd.f32 %v533_v19, %v528_v18  ;;  %v437_v36 = vadd.f32 %v435_v16, %v430_v2  ;;  %v536_v37 = vadd.f32 %v534_v22, %v529_v21  ;;  %p943_p5 = pnand %p942_p0, %p938_p11 }
  0x5a   : > { %420 = vperm.xlu1 %836, %v411_v40   ;;  %367 = vperm.xlu0 %835, %v352_v35   ;;  %v540_v35 = vmul.f32 %v539_v23, %v1267_v59  ;;  %v541_v38 = vmul.f32 %v539_v23, %v1270_v60  ;;  %v546_v39 = vstv %s1284_s2  ;;  %v438_v40 = vadd.f32 %v436_v26, %v431_v13 }
  0x5b   : > { %518 = vperm.xlu2 %837, %v509_v41   ;;  %v442_v41 = vmul.f32 %v441_v27, %v1267_v59  ;;  %v443_v42 = vmul.f32 %v441_v27, %v1270_v60  ;;  %v448_v43 = vstv %s1292_s7  ;;  %v487_v45 = vadd.f32 %v485_v29, %v480_v28 }
  0x5c   : > { %v492_v46 = vmul.f32 %v490_v17, %v1270_v60  ;;  %v493_v47 = vadd.f32 %v491_v31, %v486_v30  ;;  %v547_v52 = vmul.f32 %v546_v39, %v1287_v6  ;;  %v403_v53 = vadd.f32 %v401_v20, %v396_v24 }
  0x5d   : > { %v543_v56 = vadd.f32 %v541_v38, %v536_v37  ;;  %v548_v57 = vmul.f32 %v546_v39, %v1295_v11  ;;  %v444_v61 = vadd.f32 %v442_v41, %v437_v36  ;;  %v445_v62 = vadd.f32 %v443_v42, %v438_v40 }
  0x5e   : > { %v449_v63 = vmul.f32 %v448_v43, %v1287_v6  ;;  %v450_v0 = vmul.f32 %v448_v43, %v1295_v11  ;;  %v404_v1 = vadd.f32 %v402_v25, %v397_v32  ;;  %v494_v2 = vadd.f32 %v492_v46, %v487_v45 }
  0x5f   : > { %v499_v3 = vmul.f32 %v497_v33, %v1295_v11  ;;  %v550_v7 = vadd.f32 %v548_v57, %v543_v56 }
  0x60   : > { %v451_v8 = vadd.f32 %v449_v63, %v444_v61  ;;  %v452_v9 = vadd.f32 %v450_v0, %v445_v62 }
  0x61   : > { %v501_v15 = vadd.f32 %v499_v3, %v494_v2 }
  0x62   : > { %469 = vperm.xlu1 %836, %v460_v48   ;;  %v498_v48 = vmul.f32 %v497_v33, %v1287_v6 }
  0x63   : > { %567 = vperm.xlu2 %837, %v558_v49   ;;  %v542_v49 = vadd.f32 %v540_v35, %v535_v34 }
  0x64   : > { %v500_v4 = vadd.f32 %v498_v48, %v493_v47 }
  0x65   : > { %v549_v5 = vadd.f32 %v547_v52, %v542_v49 }
  0xb5   : > { %v519_v58 = vpop.permute.xlu2 %518 }
  0xc4   : > { %v363_v44 = vpop.permute.xlu0 %362 }
  0xc5   : > { %v412_v13 = vmul.f32 %v403_v53, %v363_v44  ;;  %v413_v14 = vmul.f32 %v404_v1, %v363_v44  ;;  %v510_v16 = vmul.f32 %v500_v4, %v363_v44  ;;  %v559_v20 = vmul.f32 %v549_v5, %v363_v44 }
  0xc6   : > { %v560_v22 = vmul.f32 %v550_v7, %v363_v44  ;;  %v461_v31 = vmul.f32 %v451_v8, %v363_v44 }
  0xcc   : > { %v421_v10 = vpop.permute.xlu1 %420  ;;  %v368_v12 = vpop.permute.xlu0 %367 }
  0xcd   : > { %v414_v17 = vmul.f32 %v1241_v50, %v368_v12  ;;  %v415_v18 = vmul.f32 %v1250_v54, %v368_v12  ;;  %v512_v19 = vmul.f32 %v1267_v59, %v368_v12  ;;  %v513_v21 = vmul.f32 %v1270_v60, %v368_v12  ;;  %v568_v59 = vpop.permute.xlu2 %567 }
  0xce   : > { %v561_v23 = vmul.f32 %v1287_v6, %v368_v12  ;;  %v562_v24 = vmul.f32 %v1295_v11, %v368_v12  ;;  %v463_v27 = vmul.f32 %v1244_v51, %v368_v12  ;;  %v464_v28 = vmul.f32 %v1253_v55, %v368_v12 }
  0xcf   : > { %v416_v25 = vadd.f32 %v414_v17, %v412_v13  ;;  %v417_v26 = vadd.f32 %v415_v18, %v413_v14  ;;  %v511_v50 = vmul.f32 %v501_v15, %v363_v44  ;;  %v462_v60 = vmul.f32 %v452_v9, %v363_v44 }
  0xd0   : > { %v563_v54 = vadd.f32 %v561_v23, %v559_v20  ;;  %v564_v29 = vadd.f32 %v562_v24, %v560_v22  ;;  %v514_v32 = vadd.f32 %v512_v19, %v510_v16  ;;  %v465_v51 = vadd.f32 %v463_v27, %v461_v31 }
  0xd1   : > { %v423_v30 = vadd.f32 %v421_v10, %v416_v25  ;;  %v424_v33 = vadd.f32 %v421_v10, %v417_v26  ;;  %v515_v6 = vadd.f32 %v513_v21, %v511_v50  ;;  %v466_v55 = vadd.f32 %v464_v28, %v462_v60 }
  0xd2   : > { %v570_v34 = vadd.f32 %v568_v59, %v563_v54  ;;  %v571_v11 = vadd.f32 %v568_v59, %v564_v29  ;;  %v521_v36 = vadd.f32 %v519_v58, %v514_v32 }
  0xd3   : > { %425 = vst [vmem:[%s316_s8] sm:$0xff] %v423_v30  ;;  %v522_v39 = vadd.f32 %v519_v58, %v515_v6 }
  0xd4   : > { %v470_v35 = vpop.permute.xlu1 %469  ;;  %572 = vst [vmem:[%s316_s8 + $0x30] sm:$0xff] %v570_v34 }
  0xd5   : > { %v472_v37 = vadd.f32 %v470_v35, %v465_v51  ;;  %v473_v38 = vadd.f32 %v470_v35, %v466_v55  ;;  %573 = vst [vmem:[%s316_s8 + $0x38] sm:$0xff] %v571_v11 }
  0xd6   : > { %426 = vst [vmem:[%s316_s8 + $0x8] sm:$0xff] %v424_v33 }
  0xd7   : > { %474 = vst [vmem:[%s316_s8 + $0x10] sm:$0xff] %v472_v37 }
  0xd8   : > { %475 = vst [vmem:[%s316_s8 + $0x18] sm:$0xff] %v473_v38 }
  0xd9   : > { %523 = vst [vmem:[%s316_s8 + $0x20] sm:$0xff] %v521_v36 }
  0xda   : > { %524 = vst [vmem:[%s316_s8 + $0x28] sm:$0xff] %v522_v39 }
  0xdb   : > { %946 = shalt.err (!%p943_p5)
}
  0xdc   : > { %755 = dma.vmem_to_hbm [thread:$0]  (%p1124_p3), %s590_s26, 1024, %s592_s12, %s575_s14  }
  0xdd PF: > { %s603_s24 = sand.u32 1, %s989_s18   ;;  %p772_p7 = pnand %p721_p9, %p1094_p6 }
  0xde   : > { %s604_s3 = scalar_lea.sflag [#allocation4], %s603_s24 }
  0xdf   : > { %p773_p10 = pneg %p772_p7 }
  0xe1   : > { %984 = dma.done.wait (%p773_p10), %s604_s3, 1024  }
  0xe2   : > { %986 = vsyncadd (%p773_p10), %s604_s3, 4294966272  ;;  %s23_s23 = sadd.s32 1, %s1009_s23   ;;  %s1403_s18 = smov %s993_s19 }
  0xe3   : > { %p20_p2 = scmp.ge.s32.totalorder %s23_s23, 4   ;;  %s1404_s19 = smov %s997_s20 }
  0xe4   : > { %s1405_s20 = smov %s1140_s27  ;;  %s1406_s21 = smov %s1005_s22 }
  0xe5   : > { %s1407_s22 = smov %s1409_s25  ;;  %22 = sbr.rel (!%p20_p2) target bundleno = 14 (0xe), region = 101 }
  0xea   :  { %610 = vsyncpa [#allocation3], 1 }
  0xeb   :  { %612 = vsyncpa [#allocation3 + $0x1], 1 }
  0xec   :  { %613 = vsyncpa [#allocation4], 1 }
  0xed   :  { %615 = vsyncpa [#allocation4 + $0x1], 1 }
  0xee   :  { %616 = vsyncpa [#allocation5], 1 }
  0xef   :  { %618 = vsyncpa [#allocation5 + $0x1], 1 }
  0xf0   :  { %619 = vsyncpa [#allocation8], 1 }

</bundles_post_ra>
